<compile_context>
chip_gen: v7x
topology: tpu7x:2x2x1
jax: 0.10.0
libtpu: 0.0.40
codegen_flags: <defaults>
</compile_context>

<pallas_src>
import functools

import jax
import jax.numpy as jnp
from jax.experimental import pallas as pl
from jax.experimental.pallas import tpu as pltpu


def _ode_cell_kernel(x_ref, wx_ref, o_ref, *, h, tn, n):
    # x_ref:  (TB, N)  f32 tile of X0 (full feature width)
    # wx_ref: (N,  TN) f32 column slab of (Wx - diag(d))
    # o_ref:  (TB, TN) output tile
    x = x_ref[...]                                                 # f32
    xw = jnp.dot(x, wx_ref[...], preferred_element_type=jnp.float32)  # MXU
    if tn == n:
        xj = x                                  # single column block: reuse the load
    else:
        j = pl.program_id(1)
        col0 = pl.multiple_of(j * tn, tn)       # tn is a multiple of 128 here
        xj = x_ref[:, pl.ds(col0, tn)]
    # TODO(synk): in the large-N (MXU-bound) regime, verify via bundle dump
    # that jnp.tanh lowers to a single EUP vtanh (not an exp decomposition)
    # and that this cast/axpy epilogue stays in the free VPU slots.
    o_ref[...] = (xj + h * jnp.tanh(xw)).astype(o_ref.dtype)


def _round_up(x, m):
    return ((x + m - 1) // m) * m


def _num_tensorcores():
    # v7x has 2 TensorCores per chip (the "parallel" grid axis is sharded
    # across them); v5e / v6e have 1.  Heuristic on the device kind string.
    try:
        kind = jax.devices()[0].device_kind.lower()
        return 2 if "v7" in kind else 1
    except Exception:  # pragma: no cover - be conservative off-TPU
        return 1


_WX_BLOCK_BUDGET = 8 * 1024 * 1024      # max bytes for one Wx column slab
_VMEM_BUDGET = 28 * 1024 * 1024         # stay under every chip's scoped default


def _pick_batch_tile(B, block_b, num_tc):
    tb = _round_up(min(block_b, _round_up(B, 8)), 8)
    if num_tc > 1:
        # v7x only: keep both TensorCores fed (ideally an even number of grid
        # steps, >= 2 per core), but never shrink below 128 rows — the kernel
        # is HBM-bound and tiny tiles just add ~0.35 us/step overhead.
        while tb >= 256 and pl.cdiv(B, tb) < 2 * num_tc:
            tb //= 2
    return max(tb, 8)


def _pick_col_tile(N, elem_bytes=4):
    if N * N * elem_bytes <= _WX_BLOCK_BUDGET or N % 128 != 0:
        return N
    tn, t = 128, 128
    while t <= N:
        if N % t == 0 and N * t * elem_bytes <= _WX_BLOCK_BUDGET:
            tn = t
        t += 128
    return tn


def ode_cell_forward(x0, wx, diag_vec, h, *, block_b=512, out_dtype=None,
                     donate_x0=False):
    """Y1 = X0 + h * tanh(X0 @ (Wx - diag(d))).

    x0: (B, N) f32; wx: (N, N) f32; diag_vec: (N,) f32.
    out_dtype: optionally emit bf16 (cuts store traffic ~25% on v5e/v6e when
    the consumer tolerates it); math stays f32 inside the kernel either way.
    donate_x0: alias X0's buffer to the output (useful when this cell is
    called repeatedly inside an integration loop under jit donation).
    """
    B, N = x0.shape
    assert wx.shape == (N, N), "ODECell forward requires n_inputs == n_neurons"
    out_dtype = x0.dtype if out_dtype is None else jnp.dtype(out_dtype)
    out_bytes = jnp.dtype(out_dtype).itemsize

    # Fold the diagonal into the weight once (O(N^2) wrapper work), keep f32.
    wx_eff = (wx - jnp.diag(diag_vec)).astype(jnp.float32)

    num_tc = _num_tensorcores()
    tb = _pick_batch_tile(B, block_b, num_tc)
    tn = _pick_col_tile(N)
    nb = pl.cdiv(B, tb)        # trailing batch block may be partial (masked)
    nj = pl.cdiv(N, tn)        # tn divides N whenever nj > 1

    # Wx buffering: resident (constant index_map) when nj == 1 — single-buffer
    # it if it is big; streamed (default double-buffer) when column-tiled.
    wx_kwargs = {}
    wx_bufs = 2
    if nj == 1 and N * tn * 4 > (2 << 20):
        wx_kwargs["pipeline_mode"] = pl.Buffered(1)
        wx_bufs = 1

    # Keep the pipeline inside VMEM: shrink the batch tile if needed, then
    # raise the scoped VMEM limit only when the estimate is still large.
    def _vmem_est(tb_):
        return (2 * tb_ * N * 4            # X0 tile, double-buffered
                + 2 * tb_ * tn * out_bytes  # output tile, double-buffered
                + wx_bufs * N * tn * 4)     # Wx slab
    while tb > 64 and _vmem_est(tb) > _VMEM_BUDGET:
        tb //= 2
    nb = pl.cdiv(B, tb)
    vmem_est = _vmem_est(tb)

    cp_kwargs = dict(dimension_semantics=("parallel", "parallel"))
    if vmem_est > 24 * 1024 * 1024:
        cp_kwargs["vmem_limit_bytes"] = int(min(vmem_est + (8 << 20),
                                                100 * 1024 * 1024))

    cost = pl.CostEstimate(
        flops=2 * B * N * N,
        transcendentals=B * N,
        bytes_accessed=B * N * 4 + N * N * 4 + B * N * out_bytes,
    )

    kernel = functools.partial(_ode_cell_kernel, h=float(h), tn=tn, n=N)
    aliases = {0: 0} if (donate_x0 and out_dtype == x0.dtype) else {}

    return pl.pallas_call(
        kernel,
        out_shape=jax.ShapeDtypeStruct((B, N), out_dtype),
        grid_spec=pltpu.PrefetchScalarGridSpec(
            num_scalar_prefetch=0,
            grid=(nb, nj),
            in_specs=[
                pl.BlockSpec((tb, N), lambda i, j: (i, 0)),          # X0 rows
                pl.BlockSpec((N, tn), lambda i, j: (0, j), **wx_kwargs),  # Wx
            ],
            out_specs=pl.BlockSpec((tb, tn), lambda i, j: (i, j)),
        ),
        compiler_params=pltpu.CompilerParams(**cp_kwargs),
        cost_estimate=cost,
        input_output_aliases=aliases,
    )(x0, wx_eff)


if __name__ == "__main__":
    # Small shapes consistent with the module: n_inputs == n_neurons == 128.
    N = 128        # n_inputs == n_neurons
    h = 0.1        # integration step

    key = jax.random.PRNGKey(0)
    k_x, k_wx, k_diag, k_bias, k_const = jax.random.split(key, 5)

    # "reset_parameters": uniform(-0.001, 0.001), as in the PyTorch module.
    wx = jax.random.uniform(k_wx, (N, N), jnp.float32, -0.001, 0.001)
    diag_vec = jax.random.uniform(k_diag, (N,), jnp.float32, -0.001, 0.001)
    bias = jax.random.uniform(k_bias, (1, N), jnp.float32, -0.001, 0.001)    # unused in forward
    const = jax.random.uniform(k_const, (1, N), jnp.float32, -0.001, 0.001)  # unused in forward

    ok = True
    for B in (8, 10):   # 10 exercises the partial (masked) trailing batch block
        x0 = jax.random.normal(jax.random.fold_in(k_x, B), (B, N), jnp.float32)
        y1 = jax.block_until_ready(ode_cell_forward(x0, wx, diag_vec, h))

        # Pure-JAX f32 reference (same algebraic form as the kernel).
        y1_ref = x0 + h * jnp.tanh(x0 @ (wx - jnp.diag(diag_vec)))
        ok &= bool(jnp.allclose(y1, y1_ref, atol=1e-4, rtol=1e-4))

    assert ok, "mismatch vs reference"
    print("KERNEL_OK")
</pallas_src>

<mosaic_0001>
module attributes {stable_mosaic.version = 11 : i64} {
  func.func @_ode_cell_kernel(%arg0: i32, %arg1: i32, %arg2: memref<8x128xf32, #tpu.memory_space<vmem>>, %arg3: memref<128x128xf32, #tpu.memory_space<vmem>>, %arg4: memref<8x128xf32, #tpu.memory_space<vmem>>) attributes {dimension_semantics = [#tpu.dimension_semantics<parallel>, #tpu.dimension_semantics<parallel>], iteration_bounds = array<i64: 1, 1>, scalar_prefetch = 0 : i64, scratch_operands = 0 : i64, tpu.core_type = #tpu.core_type<tc>, window_params = [{transform_indices = @transform_0, window_bounds = array<i64: 8, 128>}, {transform_indices = @transform_1, window_bounds = array<i64: 128, 128>}, {transform_indices = @transform_2, window_bounds = array<i64: 8, 128>}]} {
    %c0 = arith.constant 0 : index
    %c0_0 = arith.constant 0 : index
    %0 = vector.load %arg2[%c0, %c0_0] : memref<8x128xf32, #tpu.memory_space<vmem>>, vector<8x128xf32>
    %c0_1 = arith.constant 0 : index
    %c0_2 = arith.constant 0 : index
    %1 = vector.load %arg3[%c0_1, %c0_2] : memref<128x128xf32, #tpu.memory_space<vmem>>, vector<128x128xf32>
    %cst = arith.constant dense<0.000000e+00> : vector<8x128xf32>
    %2 = tpu.matmul %0, %1, %cst {dimension_numbers = #tpu.dot_dimension_numbers<[1], [0], [0], [1], [0, 0, 1, 1], [], []>} : vector<8x128xf32>, vector<128x128xf32>, vector<8x128xf32> -> vector<8x128xf32>
    %3 = math.tanh %2 : vector<8x128xf32>
    %cst_3 = arith.constant 1.000000e-01 : f32
    %4 = vector.broadcast %cst_3 : f32 to vector<8x128xf32>
    %5 = arith.mulf %4, %3 : vector<8x128xf32>
    %6 = arith.addf %0, %5 : vector<8x128xf32>
    %c0_4 = arith.constant 0 : index
    %c0_5 = arith.constant 0 : index
    %7 = vector.load %arg4[%c0_4, %c0_5] : memref<8x128xf32, #tpu.memory_space<vmem>>, vector<8x128xf32>
    tpu.vector_store %arg4[%c0_4, %c0_5], %6 {strides = array<i32>} : memref<8x128xf32, #tpu.memory_space<vmem>>, vector<8x128xf32>,
    return
  }
  func.func @transform_0(%arg0: i32, %arg1: i32) -> (i32, i32) {
    %c0_i32 = arith.constant 0 : i32
    %c0_i32_0 = arith.constant 0 : i32
    return %arg0, %c0_i32 : i32, i32
  }
  func.func @transform_1(%arg0: i32, %arg1: i32) -> (i32, i32) {
    %c0_i32 = arith.constant 0 : i32
    %c0_i32_0 = arith.constant 0 : i32
    return %c0_i32, %arg1 : i32, i32
  }
  func.func @transform_2(%arg0: i32, %arg1: i32) -> (i32, i32) {
    %c0_i32 = arith.constant 0 : i32
    return %arg0, %arg1 : i32, i32
  }
}

</mosaic_0001>

<bundles_post_ra>
// kernel: tpu_custom_call.1
= control target key start
LH: loop header
LB: loop body
LE: loop exit
PB: predicated region body
PF: predicated region fallthrough
CT: control target
= control target key end

     0   :  { %7 = vsyncpa [#allocation3], 0  ;;  %s369_s0 = inlined_call_operand.hbm [shape: f32[8,128], index: 0, kind: input, shape index: {}]   ;;  %s370_s1 = inlined_call_operand.hbm [shape: f32[128,128], index: 1, kind: input, shape index: {}]   ;;  %s371_s2 = inlined_call_operand.hbm [shape: f32[8,128], index: 2, kind: output, shape index: {}]  }
   0x1   :  { %8 = vsyncpa [#allocation6], 0 }
   0x2   :  { %9 = vsyncpa [#allocation4], 0  ;;  %s303_s9 = smov [#allocation2]   ;;  %s304_s11 = smov [#allocation5]  }
   0x3   :  { %s16_s10 = sshll.u32 %s303_s9, 4  ;;  %s25_s12 = sshll.u32 %s304_s11, 4  ;;  %s17_s10 = int_to_ptr.vmem [resolvable:$true] %s16_s10  ;;  %s326_s12 = int_to_ptr.vmem [resolvable:$true] %s25_s12 }
   0x4   :  { %s231_s15 = scalar_lea.hbm %s369_s0, 128 }
   0x5   :  { %p232_p0 = scmp.ne.s32.totalorder %s369_s0, %s231_s15  ;;  %p235_p1 = scmp.lt.u32.totalorder %s231_s15, %s369_s0 }
   0x7   :  { %p237_p2 = pnand %p235_p1, %p232_p0 }
   0x9   :  { %240 = shalt.err (!%p237_p2)
}
   0xa   :  { %s241_s20 = scalar_lea.vmem %s17_s10, 128  ;;  %p246_p4 = scmp.lt.s32.totalorder %s17_s10, %s17_s10 }
   0xb   :  { %p242_p3 = scmp.ne.s32.totalorder %s17_s10, %s241_s20  ;;  %p247_p5 = scmp.lt.s32.totalorder %s241_s20, %s241_s20 }
   0xd   :  { %p248_p6 = por %p247_p5, %p246_p4 }
   0xf   :  { %p249_p7 = pnand %p248_p6, %p242_p3 }
  0x11   :  { %252 = shalt.err (!%p249_p7)
}
  0x12   :  { %19 = dma.hbm_to_vmem [thread:$0]  %s369_s0, 128, %s17_s10, [#allocation3]  }
  0x13   :  { %s253_s25 = scalar_lea.hbm %s370_s1, 2048 }
  0x14   :  { %p254_p8 = scmp.ne.s32.totalorder %s370_s1, %s253_s25  ;;  %p257_p9 = scmp.lt.u32.totalorder %s253_s25, %s370_s1 }
  0x16   :  { %p259_p10 = pnand %p257_p9, %p254_p8 }
  0x18   :  { %262 = shalt.err (!%p259_p10)
}
  0x19   :  { %s263_s30 = scalar_lea.vmem %s326_s12, 2048  ;;  %p268_p12 = scmp.lt.s32.totalorder %s326_s12, %s326_s12 }
  0x1a   :  { %p264_p11 = scmp.ne.s32.totalorder %s326_s12, %s263_s30  ;;  %p269_p13 = scmp.lt.s32.totalorder %s263_s30, %s263_s30 }
  0x1c   :  { %p270_p0 = por %p269_p13, %p268_p12 }
  0x1e   :  { %p271_p1 = pnand %p270_p0, %p264_p11 }
  0x20   :  { %274 = shalt.err (!%p271_p1)
}
  0x21   :  { %s305_s0 = smov 128   ;;  %s306_s3 = smov 8  }
  0x22   :  { %31 = dma.hbm_to_vmem [thread:$0]  %s370_s1, 2048, %s326_s12, [#allocation6], %s305_s0, %s305_s0, %s306_s3  }
  0x23   :  { %297 = dma.done.wait [#allocation3], 128  }
  0x24   :  { %298 = vsyncadd [#allocation3], 4294967168 }
  0x25   :  { %299 = dma.done.wait [#allocation6], 2048  }
  0x26   :  { %300 = vsyncadd [#allocation6], 4294965248  ;;  %v307_v0 = vmov 0.0|0.0   ;;  %vm308_vm0 = vmmov 0   ;;  %v309_v1 = vmov 0.0   ;;  %v39_v2 = vld [vmem:[#allocation5] sm:$0xff] }
  0x27   :  { %197 = vmatprep.subr.bf16.mxu0 %v307_v0  ;;  %194 = vmatprep.mubr.msk.f32.mxu0 %vm308_vm0, %v309_v1  ;;  %v40_v3 = vld [vmem:[#allocation5 + $0x8] sm:$0xff]  ;;  %v41_v4 = vld [vmem:[#allocation5 + $0x10] sm:$0xff]  ;;  %v42_v6 = vld [vmem:[#allocation5 + $0x18] sm:$0xff]  ;;  %s310_s1 = smov [#allocation7]  }
  0x28   :  { %v198_v5 = vpack.c.bf16 %v40_v3, %v39_v2  ;;  %v201_v7 = vpack.c.bf16 %v42_v6, %v41_v4  ;;  %v43_v8 = vld [vmem:[#allocation5 + $0x20] sm:$0xff]  ;;  %v44_v9 = vld [vmem:[#allocation5 + $0x28] sm:$0xff]  ;;  %v45_v11 = vld [vmem:[#allocation5 + $0x30] sm:$0xff]  ;;  %s135_s6 = sshll.u32 %s310_s1, 4  ;;  %s136_s6 = int_to_ptr.vmem [resolvable:$true] %s135_s6 }
  0x29   :  { %v204_v10 = vpack.c.bf16 %v44_v9, %v43_v8  ;;  %v46_v12 = vld [vmem:[#allocation5 + $0x38] sm:$0xff]  ;;  %v47_v14 = vld [vmem:[#allocation5 + $0x40] sm:$0xff]  ;;  %v48_v15 = vld [vmem:[#allocation5 + $0x48] sm:$0xff]  ;;  %s275_s7 = scalar_lea.vmem %s136_s6, 128  ;;  %p280_p3 = scmp.lt.s32.totalorder %s136_s6, %s136_s6 }
  0x2a   :  { %199 = vmatpush3.bf16.msra.mxu0 %v198_v5  ;;  %v207_v13 = vpack.c.bf16 %v46_v12, %v45_v11  ;;  %v210_v16 = vpack.c.bf16 %v48_v15, %v47_v14  ;;  %v49_v17 = vld [vmem:[#allocation5 + $0x50] sm:$0xff]  ;;  %v50_v18 = vld [vmem:[#allocation5 + $0x58] sm:$0xff]  ;;  %v51_v20 = vld [vmem:[#allocation5 + $0x60] sm:$0xff]  ;;  %p276_p2 = scmp.ne.s32.totalorder %s136_s6, %s275_s7  ;;  %p281_p4 = scmp.lt.s32.totalorder %s275_s7, %s275_s7 }
  0x2b   :  { %200 = vmatprep.subr.bf16.mxu0 %v307_v0  ;;  %v213_v19 = vpack.c.bf16 %v50_v18, %v49_v17  ;;  %v52_v21 = vld [vmem:[#allocation5 + $0x68] sm:$0xff]  ;;  %v53_v23 = vld [vmem:[#allocation5 + $0x70] sm:$0xff]  ;;  %v54_v24 = vld [vmem:[#allocation5 + $0x78] sm:$0xff] }
  0x2c   :  { %v216_v22 = vpack.c.bf16 %v52_v21, %v51_v20  ;;  %v219_v25 = vpack.c.bf16 %v54_v24, %v53_v23  ;;  %v38_v26 = vld [vmem:[#allocation2] sm:$0xff]  ;;  %p282_p5 = por %p281_p4, %p280_p3 }
  0x2e   :  { %202 = vmatpush3.bf16.msra.mxu0 %v201_v7  ;;  %p283_p6 = pnand %p282_p5, %p276_p2 }
  0x2f   :  { %203 = vmatprep.subr.bf16.mxu0 %v307_v0 }
  0x32   :  { %205 = vmatpush3.bf16.msra.mxu0 %v204_v10 }
  0x33   :  { %206 = vmatprep.subr.bf16.mxu0 %v307_v0 }
  0x36   :  { %208 = vmatpush3.bf16.msra.mxu0 %v207_v13 }
  0x37   :  { %209 = vmatprep.subr.bf16.mxu0 %v307_v0 }
  0x3a   :  { %211 = vmatpush3.bf16.msra.mxu0 %v210_v16 }
  0x3b   :  { %212 = vmatprep.subr.bf16.mxu0 %v307_v0 }
  0x3e   :  { %214 = vmatpush3.bf16.msra.mxu0 %v213_v19 }
  0x3f   :  { %215 = vmatprep.subr.bf16.mxu0 %v307_v0 }
  0x42   :  { %217 = vmatpush3.bf16.msra.mxu0 %v216_v22 }
  0x43   :  { %218 = vmatprep.subr.bf16.mxu0 %v307_v0 }
  0x46   :  { %220 = vmatpush3.bf16.msra.mxu0 %v219_v25 }
  0x49   :  { %195 = vmatmul.mubr.f32.vlgmr.msra.gmra.mrb[0].mxu0 %v38_v26 }
 0x11c   :  { %v121_v27 = vpop.f32.mrb[0].mxu0 }
 0x11d   :  { %229 = vtanh.f32 %v121_v27  ;;  %v196_v28 = vpop.f32.mrb[1].mxu0 }
 0x127   :  { %v230_v29 = vpop.eup %229 }
 0x128   :  { %v126_v30 = vmul.f32 0.1, %v230_v29 }
 0x12a   :  { %v127_v31 = vadd.f32 %v126_v30, %v38_v26 }
 0x12c   :  { %128 = vst [vmem:[#allocation7] sm:$0xff] %v127_v31 }
 0x12d   :  { %286 = shalt.err (!%p283_p6)
}
 0x12e   :  { %s287_s10 = scalar_lea.hbm %s371_s2, 128 }
 0x12f   :  { %p288_p7 = scmp.ne.s32.totalorder %s371_s2, %s287_s10  ;;  %p291_p8 = scmp.lt.u32.totalorder %s287_s10, %s371_s2 }
 0x131   :  { %p293_p9 = pnand %p291_p8, %p288_p7 }
 0x133   :  { %296 = shalt.err (!%p293_p9)
}
 0x134   :  { %138 = dma.vmem_to_hbm [thread:$0]  %s136_s6, 128, %s371_s2, [#allocation4]  }
 0x135   :  { %301 = dma.done.wait [#allocation4], 128  }
 0x136   :  { %302 = vsyncadd [#allocation4], 4294967168 }
 0x137   :  { %142 = vsyncpa [#allocation3], 1 }
 0x138   :  { %143 = vsyncpa [#allocation6], 1 }
 0x139   :  { %144 = vsyncpa [#allocation4], 1 }

</bundles_post_ra>
